<compile_context>
chip_gen: v7x
topology: tpu7x:2x2x1
jax: 0.10.0
libtpu: 0.0.40
codegen_flags: <defaults>
</compile_context>

<pallas_src>
import functools

import jax
import jax.numpy as jnp
from jax.experimental import pallas as pl
from jax.experimental.pallas import tpu as pltpu


def _vq_kernel(x_ref, w_ref, msq_ref, o_ref, *, num_heads, num_clusters):
    # x_ref  : (TM, H*D)   lane-dense activations (bf16 or f32, native dtype)
    # w_ref  : (H*D, H*K)  block-diagonal means matrix, pre-scaled by -2
    # msq_ref: (1, H*K)    per-(head, cluster) squared norms (f32)
    # o_ref  : (H, TM)     int32 cluster ids, lane-dense along rows
    x = x_ref[...]
    # All heads' -2 * (x . means^T) in a single MXU matmul (block-diagonal W),
    # bf16 goes straight to the MXU with f32 accumulation.
    scores = jnp.dot(x, w_ref[...], preferred_element_type=jnp.float32)  # (TM, H*K)
    # ||x||^2 is constant over the cluster axis -> irrelevant to the argmin.
    dists = msq_ref[...] + scores                                        # (TM, H*K)

    k = num_clusters
    tm = dists.shape[0]
    # Hoisted out of the per-head loop (identical shape each iteration).
    idx = jax.lax.broadcasted_iota(jnp.int32, (tm, k), 1)
    for h in range(num_heads):                       # small static unrolled loop
        d_h = dists[:, h * k:(h + 1) * k]            # (TM, K) static lane slice
        min_d = jnp.min(d_h, axis=-1, keepdims=True)
        # first index attaining the minimum (matches torch.argmin tie-breaking)
        ids_h = jnp.min(jnp.where(d_h == min_d, idx, k), axis=-1)        # (TM,)
        # Lane-dense store: full tm-wide row -> unmasked vst.
        o_ref[h, :] = ids_h.astype(jnp.int32)


def _round_up(x, m):
    return (x + m - 1) // m * m


def vector_quantization(x, means, *, row_tile=1024):
    """Forward pass of VectorQuantization (inference).

    x     : (B, N, H*D)
    means : (H, K, D)
    returns cluster_ids : (B, N, H) int32
    """
    H, K, D = means.shape
    B, N, HD = x.shape
    assert HD == H * D, f"input feature dim must be {H * D}, got {HD}"

    rows = B * N
    x2 = x.reshape(rows, HD)
    if x2.dtype not in (jnp.bfloat16, jnp.float32):
        x2 = x2.astype(jnp.float32)

    means_f32 = means.astype(jnp.float32)
    # Block-diagonal (H*D, H*K) matrix with the -2 scale folded in:
    #   W[(h,d),(g,k)] = -2 * means[h,k,d] * delta_{h,g}
    eye = jnp.eye(H, dtype=jnp.float32)
    w = (-2.0 * jnp.einsum("hkd,hg->hdgk", means_f32, eye)).reshape(HD, H * K)
    if x2.dtype == jnp.bfloat16:
        w = w.astype(jnp.bfloat16)          # bf16 x bf16 -> f32 on the MXU
    msq = jnp.sum(means_f32 * means_f32, axis=-1).reshape(1, H * K)  # (1, H*K)

    # Row tile: large tiles for this HBM-bound kernel, no wrapper-side pad.
    # tm must be a multiple of 128 (lane-dense output last dim) unless it
    # covers the full row extent; also keep >= 2 grid steps on medium inputs
    # so v7x's two TensorCores both get work on the "parallel" row axis.
    if rows <= 256:
        tm = rows                              # single full-extent block
    else:
        tm = min(_round_up(row_tile, 128), _round_up(pl.cdiv(rows, 2), 128))
        tm = max(tm, 128)
    grid = pl.cdiv(rows, tm)

    # Explicit VMEM budget: double-buffered in/out blocks + constants + headroom;
    # cap relative to the physical VMEM of the current generation.
    in_bytes = tm * HD * x2.dtype.itemsize
    out_bytes = H * tm * 4
    const_bytes = HD * H * K * w.dtype.itemsize + H * K * 4
    need = 2 * (in_bytes + out_bytes) + 2 * const_bytes + (4 << 20)
    try:
        phys = int(getattr(pltpu.get_tpu_info(), "vmem_capacity_bytes", 64 << 20))
    except Exception:  # pragma: no cover - conservative fallback
        phys = 64 << 20
    cap = max(16 << 20, min(phys - (16 << 20), 100 << 20))
    vmem_limit = int(min(max(need, 16 << 20), cap))

    kernel = functools.partial(_vq_kernel, num_heads=H, num_clusters=K)
    ids_hr = pl.pallas_call(
        kernel,
        out_shape=jax.ShapeDtypeStruct((H, rows), jnp.int32),
        grid_spec=pltpu.PrefetchScalarGridSpec(
            num_scalar_prefetch=0,
            grid=(grid,),
            in_specs=[
                pl.BlockSpec((tm, HD), lambda i: (i, 0)),
                pl.BlockSpec((HD, H * K), lambda i: (0, 0)),   # grid-invariant
                pl.BlockSpec((1, H * K), lambda i: (0, 0)),    # grid-invariant
            ],
            out_specs=pl.BlockSpec((H, tm), lambda i: (0, i)),
        ),
        compiler_params=pltpu.CompilerParams(
            dimension_semantics=("parallel",),
            vmem_limit_bytes=vmem_limit),
    )(x2, w, msq)

    # (H, rows) -> (B, N, H); one small transpose of int32 ids in the wrapper.
    return jnp.transpose(ids_hr).reshape(B, N, H)


def _reference(x, means):
    """Pure-JAX mirror of the PyTorch forward (full distance formula)."""
    H, K, D = means.shape
    B, N, HD = x.shape
    xh = x.reshape(B, N, H, D).astype(jnp.float32)
    m = means.astype(jnp.float32)
    dists = (jnp.sum(xh * xh, axis=-1, keepdims=True)
             - 2.0 * jnp.einsum("bnhd,hkd->bnhk", xh, m)
             + jnp.sum(m * m, axis=-1)[None, None, :, :])
    return jnp.argmin(dists, axis=-1).astype(jnp.int32)


if __name__ == "__main__":
    key = jax.random.PRNGKey(0)
    B, N, H, D, K = 2, 8, 4, 32, 8          # x feature dim = H*D = 128 (lane-dense)

    kx, km = jax.random.split(key)
    x = jax.random.normal(kx, (B, N, H * D), dtype=jnp.float32)
    means = jax.random.normal(km, (H, K, D), dtype=jnp.float32)  # registered buffer

    ids = vector_quantization(x, means)
    ids = jax.block_until_ready(ids)

    ref = _reference(x, means)
    assert ids.shape == (B, N, H)
    assert ids.dtype == jnp.int32
    assert jnp.array_equal(ids, ref)

    print("KERNEL_OK")
</pallas_src>

<mosaic_0001>
module attributes {stable_mosaic.version = 11 : i64} {
  func.func @_vq_kernel(%arg0: i32, %arg1: memref<16x128xf32, #tpu.memory_space<vmem>>, %arg2: memref<128x32xf32, #tpu.memory_space<vmem>>, %arg3: memref<1x32xf32, #tpu.memory_space<vmem>>, %arg4: memref<4x16xi32, #tpu.memory_space<vmem>>) attributes {dimension_semantics = [#tpu.dimension_semantics<parallel>], iteration_bounds = array<i64: 1>, scalar_prefetch = 0 : i64, scratch_operands = 0 : i64, tpu.core_type = #tpu.core_type<tc>, window_params = [{transform_indices = @transform_0, window_bounds = array<i64: 16, 128>}, {pipeline_mode = #tpu.pipeline_mode<synchronous>, transform_indices = @transform_1, window_bounds = array<i64: 128, 32>}, {pipeline_mode = #tpu.pipeline_mode<synchronous>, transform_indices = @transform_2, window_bounds = array<i64: 1, 32>}, {transform_indices = @transform_3, window_bounds = array<i64: 4, 16>}]} {
    %c0 = arith.constant 0 : index
    %c0_0 = arith.constant 0 : index
    %0 = vector.load %arg1[%c0, %c0_0] : memref<16x128xf32, #tpu.memory_space<vmem>>, vector<16x128xf32>
    %c0_1 = arith.constant 0 : index
    %c0_2 = arith.constant 0 : index
    %1 = vector.load %arg2[%c0_1, %c0_2] : memref<128x32xf32, #tpu.memory_space<vmem>>, vector<128x32xf32>
    %cst = arith.constant dense<0.000000e+00> : vector<16x32xf32>
    %2 = tpu.matmul %0, %1, %cst {dimension_numbers = #tpu.dot_dimension_numbers<[1], [0], [0], [1], [0, 0, 1, 1], [], []>} : vector<16x128xf32>, vector<128x32xf32>, vector<16x32xf32> -> vector<16x32xf32>
    %c0_3 = arith.constant 0 : index
    %c0_4 = arith.constant 0 : index
    %3 = vector.load %arg3[%c0_3, %c0_4] : memref<1x32xf32, #tpu.memory_space<vmem>>, vector<1x32xf32>
    %4 = vector.broadcast %3 : vector<1x32xf32> to vector<16x32xf32>
    %5 = arith.addf %4, %2 : vector<16x32xf32>
    %6 = tpu.iota {dimensions = array<i32: 1>} : vector<16x8xi32>
    %7 = vector.extract_strided_slice %5 {offsets = [0, 0], sizes = [16, 8], strides = [1, 1]} : vector<16x32xf32> to vector<16x8xf32>
    %cst_5 = arith.constant dense<0x7F800000> : vector<16xf32>
    %8 = vector.multi_reduction <minimumf>, %7, %cst_5 [1] : vector<16x8xf32> to vector<16xf32>
    %9 = vector.shape_cast %8 : vector<16xf32> to vector<16x1xf32>
    %10 = vector.broadcast %9 : vector<16x1xf32> to vector<16x8xf32>
    %11 = arith.cmpf oeq, %7, %10 : vector<16x8xf32>
    %c8_i32 = arith.constant 8 : i32
    %12 = vector.broadcast %c8_i32 : i32 to vector<16x8xi32>
    %13 = arith.select %11, %6, %12 : vector<16x8xi1>, vector<16x8xi32>
    %cst_6 = arith.constant dense<2147483647> : vector<16xi32>
    %14 = vector.multi_reduction <minsi>, %13, %cst_6 [1] : vector<16x8xi32> to vector<16xi32>
    %c0_7 = arith.constant 0 : index
    %c0_8 = arith.constant 0 : index
    %15 = vector.load %arg4[%c0_7, %c0_8] : memref<4x16xi32, #tpu.memory_space<vmem>>, vector<1x16xi32>
    %16 = vector.shape_cast %15 : vector<1x16xi32> to vector<16xi32>
    %17 = vector.shape_cast %14 : vector<16xi32> to vector<1x16xi32>
    tpu.vector_store %arg4[%c0_7, %c0_8], %17 {strides = array<i32>} : memref<4x16xi32, #tpu.memory_space<vmem>>, vector<1x16xi32>,
    %18 = vector.extract_strided_slice %5 {offsets = [0, 8], sizes = [16, 8], strides = [1, 1]} : vector<16x32xf32> to vector<16x8xf32>
    %cst_9 = arith.constant dense<0x7F800000> : vector<16xf32>
    %19 = vector.multi_reduction <minimumf>, %18, %cst_9 [1] : vector<16x8xf32> to vector<16xf32>
    %20 = vector.shape_cast %19 : vector<16xf32> to vector<16x1xf32>
    %21 = vector.broadcast %20 : vector<16x1xf32> to vector<16x8xf32>
    %22 = arith.cmpf oeq, %18, %21 : vector<16x8xf32>
    %c8_i32_10 = arith.constant 8 : i32
    %23 = vector.broadcast %c8_i32_10 : i32 to vector<16x8xi32>
    %24 = arith.select %22, %6, %23 : vector<16x8xi1>, vector<16x8xi32>
    %cst_11 = arith.constant dense<2147483647> : vector<16xi32>
    %25 = vector.multi_reduction <minsi>, %24, %cst_11 [1] : vector<16x8xi32> to vector<16xi32>
    %c1 = arith.constant 1 : index
    %c0_12 = arith.constant 0 : index
    %26 = vector.load %arg4[%c1, %c0_12] : memref<4x16xi32, #tpu.memory_space<vmem>>, vector<1x16xi32>
    %27 = vector.shape_cast %26 : vector<1x16xi32> to vector<16xi32>
    %28 = vector.shape_cast %25 : vector<16xi32> to vector<1x16xi32>
    tpu.vector_store %arg4[%c1, %c0_12], %28 {strides = array<i32>} : memref<4x16xi32, #tpu.memory_space<vmem>>, vector<1x16xi32>,
    %29 = vector.extract_strided_slice %5 {offsets = [0, 16], sizes = [16, 8], strides = [1, 1]} : vector<16x32xf32> to vector<16x8xf32>
    %cst_13 = arith.constant dense<0x7F800000> : vector<16xf32>
    %30 = vector.multi_reduction <minimumf>, %29, %cst_13 [1] : vector<16x8xf32> to vector<16xf32>
    %31 = vector.shape_cast %30 : vector<16xf32> to vector<16x1xf32>
    %32 = vector.broadcast %31 : vector<16x1xf32> to vector<16x8xf32>
    %33 = arith.cmpf oeq, %29, %32 : vector<16x8xf32>
    %c8_i32_14 = arith.constant 8 : i32
    %34 = vector.broadcast %c8_i32_14 : i32 to vector<16x8xi32>
    %35 = arith.select %33, %6, %34 : vector<16x8xi1>, vector<16x8xi32>
    %cst_15 = arith.constant dense<2147483647> : vector<16xi32>
    %36 = vector.multi_reduction <minsi>, %35, %cst_15 [1] : vector<16x8xi32> to vector<16xi32>
    %c2 = arith.constant 2 : index
    %c0_16 = arith.constant 0 : index
    %37 = vector.load %arg4[%c2, %c0_16] : memref<4x16xi32, #tpu.memory_space<vmem>>, vector<1x16xi32>
    %38 = vector.shape_cast %37 : vector<1x16xi32> to vector<16xi32>
    %39 = vector.shape_cast %36 : vector<16xi32> to vector<1x16xi32>
    tpu.vector_store %arg4[%c2, %c0_16], %39 {strides = array<i32>} : memref<4x16xi32, #tpu.memory_space<vmem>>, vector<1x16xi32>,
    %40 = vector.extract_strided_slice %5 {offsets = [0, 24], sizes = [16, 8], strides = [1, 1]} : vector<16x32xf32> to vector<16x8xf32>
    %cst_17 = arith.constant dense<0x7F800000> : vector<16xf32>
    %41 = vector.multi_reduction <minimumf>, %40, %cst_17 [1] : vector<16x8xf32> to vector<16xf32>
    %42 = vector.shape_cast %41 : vector<16xf32> to vector<16x1xf32>
    %43 = vector.broadcast %42 : vector<16x1xf32> to vector<16x8xf32>
    %44 = arith.cmpf oeq, %40, %43 : vector<16x8xf32>
    %c8_i32_18 = arith.constant 8 : i32
    %45 = vector.broadcast %c8_i32_18 : i32 to vector<16x8xi32>
    %46 = arith.select %44, %6, %45 : vector<16x8xi1>, vector<16x8xi32>
    %cst_19 = arith.constant dense<2147483647> : vector<16xi32>
    %47 = vector.multi_reduction <minsi>, %46, %cst_19 [1] : vector<16x8xi32> to vector<16xi32>
    %c3 = arith.constant 3 : index
    %c0_20 = arith.constant 0 : index
    %48 = vector.load %arg4[%c3, %c0_20] : memref<4x16xi32, #tpu.memory_space<vmem>>, vector<1x16xi32>
    %49 = vector.shape_cast %48 : vector<1x16xi32> to vector<16xi32>
    %50 = vector.shape_cast %47 : vector<16xi32> to vector<1x16xi32>
    tpu.vector_store %arg4[%c3, %c0_20], %50 {strides = array<i32>} : memref<4x16xi32, #tpu.memory_space<vmem>>, vector<1x16xi32>,
    return
  }
  func.func @transform_0(%arg0: i32) -> (i32, i32) {
    %c0_i32 = arith.constant 0 : i32
    %c0_i32_0 = arith.constant 0 : i32
    return %arg0, %c0_i32 : i32, i32
  }
  func.func @transform_1(%arg0: i32) -> (i32, i32) {
    %c0_i32 = arith.constant 0 : i32
    %c0_i32_0 = arith.constant 0 : i32
    %c0_i32_1 = arith.constant 0 : i32
    return %c0_i32, %c0_i32_0 : i32, i32
  }
  func.func @transform_2(%arg0: i32) -> (i32, i32) {
    %c0_i32 = arith.constant 0 : i32
    %c0_i32_0 = arith.constant 0 : i32
    %c0_i32_1 = arith.constant 0 : i32
    return %c0_i32, %c0_i32_0 : i32, i32
  }
  func.func @transform_3(%arg0: i32) -> (i32, i32) {
    %c0_i32 = arith.constant 0 : i32
    %c0_i32_0 = arith.constant 0 : i32
    return %c0_i32, %arg0 : i32, i32
  }
}

</mosaic_0001>

<bundles_post_ra>
// kernel: tpu_custom_call.1
= control target key start
LH: loop header
LB: loop body
LE: loop exit
PB: predicated region body
PF: predicated region fallthrough
CT: control target
= control target key end

     0   :  { %s615_s0 = inlined_call_operand.vmem [shape: f32[16,128], index: 0, kind: input, shape index: {}]   ;;  %s616_s1 = inlined_call_operand.vmem [shape: f32[128,32], index: 1, kind: input, shape index: {}]   ;;  %s617_s2 = inlined_call_operand.vmem [shape: f32[1,32], index: 2, kind: input, shape index: {}]   ;;  %s618_s3 = inlined_call_operand.hbm [shape: s32[4,16], index: 3, kind: output, shape index: {}]  }
   0x1   :  { %v17_v0 = vld [vmem:[%s616_s1] sm:$0xff]  ;;  %v18_v1 = vld [vmem:[%s616_s1 + $0x8] sm:$0xff]  ;;  %v19_v2 = vld [vmem:[%s616_s1 + $0x10] sm:$0xff] }
   0x2   :  { %v399_v3 = vpack.c.bf16 %v18_v1, %v17_v0  ;;  %v20_v4 = vld [vmem:[%s616_s1 + $0x18] sm:$0xff]  ;;  %v21_v6 = vld [vmem:[%s616_s1 + $0x20] sm:$0xff]  ;;  %v22_v7 = vld [vmem:[%s616_s1 + $0x28] sm:$0xff] }
   0x3   :  { %v403_v5 = vpack.c.bf16 %v20_v4, %v19_v2  ;;  %v407_v8 = vpack.c.bf16 %v22_v7, %v21_v6  ;;  %v15_v9 = vld [vmem:[%s615_s0] sm:$0xff]  ;;  %v23_v10 = vld [vmem:[%s616_s1 + $0x30] sm:$0xff]  ;;  %v24_v11 = vld [vmem:[%s616_s1 + $0x38] sm:$0xff] }
   0x4   :  { %400 = vmatprep.subr.bf16.mxu0 %v399_v3  ;;  %396 = vmatprep.mubr.f32.mxu0 %v15_v9 }
   0x5   :  { %402 = vmatpush3.bf16.msra.mxu0 %v399_v3 }
   0x6   :  { %404 = vmatprep.subr.bf16.mxu0 %v403_v5 }
   0x7   :  { %8 = vsyncpa [#allocation3], 0  ;;  %v411_v12 = vpack.c.bf16 %v24_v11, %v23_v10  ;;  %v25_v13 = vld [vmem:[%s616_s1 + $0x40] sm:$0xff]  ;;  %v26_v14 = vld [vmem:[%s616_s1 + $0x48] sm:$0xff]  ;;  %vm169_vm0 = vcmask 130112   ;;  %vm119_vm1 = vcmask 64512   ;;  %v117_v39 = vlaneseq }
   0x8   :  { %v415_v15 = vpack.c.bf16 %v26_v14, %v25_v13  ;;  %v27_v16 = vld [vmem:[%s616_s1 + $0x50] sm:$0xff]  ;;  %v28_v17 = vld [vmem:[%s616_s1 + $0x58] sm:$0xff]  ;;  %v29_v19 = vld [vmem:[%s616_s1 + $0x60] sm:$0xff]  ;;  %vm225_vm2 = vcmask 195712   ;;  %vm278_vm3 = vcmask 261312   ;;  %s462_s23 = smov [#allocation2]  }
   0x9   :  { %406 = vmatpush3.bf16.msra.mxu0 %v403_v5  ;;  %v419_v18 = vpack.c.bf16 %v28_v17, %v27_v16  ;;  %v30_v20 = vld [vmem:[%s616_s1 + $0x68] sm:$0xff]  ;;  %v31_v22 = vld [vmem:[%s616_s1 + $0x70] sm:$0xff]  ;;  %v32_v23 = vld [vmem:[%s616_s1 + $0x78] sm:$0xff]  ;;  %v561_v40 = vand.u32 127, %v117_v39  ;;  %s460_s1 = smov 24   ;;  %s337_s24 = sshll.u32 %s462_s23, 4  ;;  %s338_s24 = int_to_ptr.vmem [resolvable:$true] %s337_s24 }
   0xa   :  { %408 = vmatprep.subr.bf16.mxu0 %v407_v8  ;;  %v423_v21 = vpack.c.bf16 %v30_v20, %v29_v19  ;;  %v427_v24 = vpack.c.bf16 %v32_v23, %v31_v22  ;;  %v16_v25 = vld [vmem:[%s615_s0 + $0x8] sm:$0xff]  ;;  %v345_v26 = vld [vmem:[%s617_s2] ss:$0 sm:$0xff]  ;;  %s459_s0 = smov 16   ;;  %s461_s2 = smov 8  }
   0xb   :  { %s435_s25 = scalar_lea.vmem %s338_s24, 64  ;;  %p440_p1 = scmp.lt.s32.totalorder %s338_s24, %s338_s24 }
   0xc   :  { %p436_p0 = scmp.ne.s32.totalorder %s338_s24, %s435_s25  ;;  %p441_p2 = scmp.lt.s32.totalorder %s435_s25, %s435_s25 }
   0xd   :  { %410 = vmatpush3.bf16.msra.mxu0 %v407_v8 }
   0xe   :  { %412 = vmatprep.subr.bf16.mxu0 %v411_v12  ;;  %p442_p3 = por %p441_p2, %p440_p1 }
  0x10   :  { %p443_p4 = pnand %p442_p3, %p436_p0 }
  0x11   :  { %414 = vmatpush3.bf16.msra.mxu0 %v411_v12 }
  0x12   :  { %416 = vmatprep.subr.bf16.mxu0 %v415_v15 }
  0x15   :  { %418 = vmatpush3.bf16.msra.mxu0 %v415_v15 }
  0x16   :  { %420 = vmatprep.subr.bf16.mxu0 %v419_v18 }
  0x19   :  { %422 = vmatpush3.bf16.msra.mxu0 %v419_v18 }
  0x1a   :  { %424 = vmatprep.subr.bf16.mxu0 %v423_v21 }
  0x1d   :  { %426 = vmatpush3.bf16.msra.mxu0 %v423_v21 }
  0x1e   :  { %428 = vmatprep.subr.bf16.mxu0 %v427_v24 }
  0x21   :  { %430 = vmatpush3.bf16.msra.mxu0 %v427_v24 }
  0x24   :  { %397 = vmatmul.mubr.f32.vlgmr.msra.gmra.mrb[0].mxu0 %v16_v25 }
  0xf7   :  { %v398_v27 = vpop.f32.mrb[0].mxu0 }
  0xf8   :  { %v540_v28 = vadd.f32 %v398_v27, %v345_v26  ;;  %v99_v29 = vpop.f32.mrb[1].mxu0 }
  0xf9   :  { %v542_v30 = vadd.f32 %v345_v26, %v99_v29 }
  0xfa   :  { %v176_v31 = vsel %vm169_vm0, %v540_v28, inf  ;;  %v123_v32 = vsel %vm119_vm1, %v540_v28, inf  ;;  %v229_v33 = vsel %vm225_vm2, %v540_v28, inf  ;;  %v282_v35 = vsel %vm278_vm3, %v540_v28, inf }
  0xfb   :  { %177 = vmin.xlane.f32.xlu1 %v176_v31  ;;  %124 = vmin.xlane.f32.xlu0 %v123_v32  ;;  %v120_v34 = vsel %vm119_vm1, %v542_v30, inf  ;;  %v226_v36 = vsel %vm225_vm2, %v542_v30, inf  ;;  %v173_v37 = vsel %vm169_vm0, %v542_v30, inf  ;;  %v279_v38 = vsel %vm278_vm3, %v542_v30, inf }
  0xff   :  { %230 = vmin.xlane.f32.xlu1 %v229_v33  ;;  %121 = vmin.xlane.f32.xlu0 %v120_v34 }
 0x103   :  { %283 = vmin.xlane.f32.xlu1 %v282_v35  ;;  %227 = vmin.xlane.f32.xlu0 %v226_v36 }
 0x107   :  { %174 = vmin.xlane.f32.xlu1 %v173_v37  ;;  %280 = vmin.xlane.f32.xlu0 %v279_v38 }
 0x118   :  { %234 = vrot.lane.b32.xlu1 %v561_v40, %s459_s0 }
 0x11c   :  { %287 = vrot.lane.b32.xlu1 %v561_v40, %s460_s1 }
 0x11d   :  { %181 = vrot.lane.b32.xlu0 %v561_v40, %s461_s2 }
 0x188   :  { %v178_v41 = vpop.xlane.xlu1 %177  ;;  %v125_v42 = vpop.xlane.xlu0 %124 }
 0x189   :  { %vm127_vm4 = vcmp.eq.f32.partialorder %v540_v28, %v125_v42  ;;  %vm180_vm6 = vcmp.eq.f32.partialorder %v540_v28, %v178_v41 }
 0x18a   :  { %v129_v43 = vsel %vm127_vm4, %v561_v40, 8 }
 0x18b   :  { %v145_v44 = vsel %vm119_vm1, %v129_v43, 2147483647 }
 0x18c   :  { %v231_v45 = vpop.xlane.xlu1 %230  ;;  %v122_v46 = vpop.xlane.xlu0 %121  ;;  %v147_v47 = vshra.s32 %v145_v44, 16  ;;  %v146_v20 = vand.u32 65535, %v145_v44 }
 0x18d   :  { %vm126_vm5 = vcmp.eq.f32.partialorder %v542_v30, %v122_v46  ;;  %vm233_vm7 = vcmp.eq.f32.partialorder %v540_v28, %v231_v45 }
 0x18e   :  { %v128_v48 = vsel %vm126_vm5, %v561_v40, 8  ;;  %v149_v49 = vcvt.s32.f32 %v147_v47  ;;  %v148_v22 = vcvt.s32.f32 %v146_v20  ;;  %vm171_vm5 = vcmask 122880  }
 0x18f   :  { %v130_v50 = vsel %vm119_vm1, %v128_v48, 2147483647 }
 0x190   :  { %v284_v51 = vpop.xlane.xlu1 %283  ;;  %150 = vmin.xlane.f32.xlu0 %v149_v49  ;;  %v228_v52 = vpop.xlane.xlu0 %227  ;;  %v132_v53 = vshra.s32 %v130_v50, 16  ;;  %v131_v23 = vand.u32 65535, %v130_v50 }
 0x191   :  { %vm232_vm8 = vcmp.eq.f32.partialorder %v542_v30, %v228_v52  ;;  %vm286_vm11 = vcmp.eq.f32.partialorder %v540_v28, %v284_v51 }
 0x192   :  { %v134_v54 = vcvt.s32.f32 %v132_v53  ;;  %v133_v26 = vcvt.s32.f32 %v131_v23 }
 0x194   :  { %v175_v55 = vpop.xlane.xlu1 %174  ;;  %135 = vmin.xlane.f32.xlu1 %v134_v54  ;;  %v281_v56 = vpop.xlane.xlu0 %280 }
 0x195   :  { %vm179_vm9 = vcmp.eq.f32.partialorder %v542_v30, %v175_v55  ;;  %vm285_vm10 = vcmp.eq.f32.partialorder %v542_v30, %v281_v56  ;;  %v161_v55 = vshrl.u32 %v117_v39, 7  ;;  %v164_v56 = vadd.s32 4294967288, %v561_v40 }
 0x198   :  { %v235_v57 = vpop.permute.xlu1 %234  ;;  %v182_v58 = vpop.permute.xlu0 %181 }
 0x199   :  { %v236_v59 = vsel %vm232_vm8, %v235_v57, 8  ;;  %v237_v60 = vsel %vm233_vm7, %v235_v57, 8  ;;  %v184_v61 = vsel %vm180_vm6, %v182_v58, 8  ;;  %v183_v2 = vsel %vm179_vm9, %v182_v58, 8 }
 0x19a   :  { %v576_v62 = vsel %vm225_vm2, %v236_v59, 2147483647  ;;  %v253_v63 = vsel %vm225_vm2, %v237_v60, 2147483647  ;;  %v200_v0 = vsel %vm169_vm0, %v184_v61, 2147483647  ;;  %v167_v61 = vsub.s32 %v164_v56, %v161_v55 }
 0x19b   :  { %v240_v1 = vshra.s32 %v576_v62, 16  ;;  %v202_v4 = vshra.s32 %v200_v0, 16  ;;  %v255_v9 = vshra.s32 %v253_v63, 16  ;;  %v185_v10 = vsel %vm169_vm0, %v183_v2, 2147483647 }
 0x19c   :  { %v288_v3 = vpop.permute.xlu1 %287  ;;  %v187_v15 = vshra.s32 %v185_v10, 16  ;;  %v201_v28 = vand.u32 65535, %v200_v0  ;;  %v254_v31 = vand.u32 65535, %v253_v63  ;;  %v186_v35 = vand.u32 65535, %v185_v10 }
 0x19d   :  { %v289_v5 = vsel %vm285_vm10, %v288_v3, 8  ;;  %v242_v6 = vcvt.s32.f32 %v240_v1  ;;  %v204_v8 = vcvt.s32.f32 %v202_v4  ;;  %v290_v12 = vsel %vm286_vm11, %v288_v3, 8 }
 0x19e   :  { %v584_v7 = vsel %vm278_vm3, %v289_v5, 2147483647  ;;  %v257_v14 = vcvt.s32.f32 %v255_v9  ;;  %v306_v16 = vsel %vm278_vm3, %v290_v12, 2147483647  ;;  %v189_v17 = vcvt.s32.f32 %v187_v15 }
 0x19f   :  { %243 = vmin.xlane.f32.xlu1 %v242_v6  ;;  %v293_v11 = vshra.s32 %v584_v7, 16  ;;  %205 = vmin.xlane.f32.xlu0 %v204_v8  ;;  %v308_v18 = vshra.s32 %v306_v16, 16  ;;  %v203_v30 = vcvt.s32.f32 %v201_v28  ;;  %v256_v34 = vcvt.s32.f32 %v254_v31 }
 0x1a0   :  { %v188_v41 = vcvt.s32.f32 %v186_v35  ;;  %v239_v42 = vand.u32 65535, %v576_v62  ;;  %v307_v43 = vand.u32 65535, %v306_v16  ;;  %v162_v1 = vsub.s32 %v561_v40, %v161_v55 }
 0x1a1   :  { %v295_v13 = vcvt.s32.f32 %v293_v11  ;;  %v310_v19 = vcvt.s32.f32 %v308_v18 }
 0x1a2   :  { %v241_v47 = vcvt.s32.f32 %v239_v42  ;;  %v309_v48 = vcvt.s32.f32 %v307_v43 }
 0x1a3   :  { %296 = vmin.xlane.f32.xlu1 %v295_v13  ;;  %258 = vmin.xlane.f32.xlu0 %v257_v14 }
 0x1a7   :  { %190 = vmin.xlane.f32.xlu0 %v189_v17 }
 0x1ab   :  { %311 = vmin.xlane.f32.xlu0 %v310_v19 }
 0x21d   :  { %v151_v21 = vpop.xlane.xlu0 %150 }
 0x21e   :  { %vm152_vm12 = vcmp.eq.f32.partialorder %v149_v49, %v151_v21  ;;  %v292_v49 = vand.u32 65535, %v584_v7 }
 0x21f   :  { %v153_v24 = vsel %vm152_vm12, %v148_v22, inf }
 0x220   :  { %154 = vmin.xlane.f32.xlu0 %v153_v24  ;;  %v294_v52 = vcvt.s32.f32 %v292_v49 }
 0x221   :  { %v136_v25 = vpop.xlane.xlu1 %135 }
 0x222   :  { %vm137_vm13 = vcmp.eq.f32.partialorder %v134_v54, %v136_v25  ;;  %v157_v54 = vcvt.f32.s32 %v151_v21  ;;  %v142_v58 = vcvt.f32.s32 %v136_v25 }
 0x223   :  { %v138_v27 = vsel %vm137_vm13, %v133_v26, inf }
 0x224   :  { %139 = vmin.xlane.f32.xlu1 %v138_v27  ;;  %v158_v60 = vshll.u32 %v157_v54, 16  ;;  %v143_v63 = vshll.u32 %v142_v58, 16 }
 0x22c   :  { %v206_v29 = vpop.xlane.xlu0 %205  ;;  %v244_v36 = vpop.xlane.xlu1 %243 }
 0x22d   :  { %vm207_vm14 = vcmp.eq.f32.partialorder %v204_v8, %v206_v29  ;;  %vm245_vm2 = vcmp.eq.f32.partialorder %v242_v6, %v244_v36  ;;  %v212_v7 = vcvt.f32.s32 %v206_v29 }
 0x22e   :  { %v208_v32 = vsel %vm207_vm14, %v203_v30, inf  ;;  %v246_v50 = vsel %vm245_vm2, %v241_v47, inf }
 0x22f   :  { %209 = vmin.xlane.f32.xlu0 %v208_v32  ;;  %v213_v10 = vshll.u32 %v212_v7, 16 }
 0x230   :  { %v259_v33 = vpop.xlane.xlu0 %258  ;;  %v297_v45 = vpop.xlane.xlu1 %296 }
 0x231   :  { %vm260_vm15 = vcmp.eq.f32.partialorder %v257_v14, %v259_v33  ;;  %vm298_vm4 = vcmp.eq.f32.partialorder %v295_v13, %v297_v45  ;;  %v265_v12 = vcvt.f32.s32 %v259_v33  ;;  %v250_v13 = vcvt.f32.s32 %v244_v36 }
 0x232   :  { %v261_v37 = vsel %vm260_vm15, %v256_v34, inf  ;;  %v299_v53 = vsel %vm298_vm4, %v294_v52, inf  ;;  %v303_v22 = vcvt.f32.s32 %v297_v45 }
 0x233   :  { %262 = vmin.xlane.f32.xlu0 %v261_v37  ;;  %v266_v18 = vshll.u32 %v265_v12, 16  ;;  %v251_v21 = vshll.u32 %v250_v13, 16 }
 0x234   :  { %v191_v38 = vpop.xlane.xlu0 %190  ;;  %v304_v33 = vshll.u32 %v303_v22, 16 }
 0x235   :  { %vm192_vm1 = vcmp.eq.f32.partialorder %v189_v17, %v191_v38  ;;  %v197_v9 = vcvt.f32.s32 %v191_v38 }
 0x236   :  { %v193_v44 = vsel %vm192_vm1, %v188_v41, inf }
 0x237   :  { %194 = vmin.xlane.f32.xlu1 %v193_v44  ;;  %v198_v40 = vshll.u32 %v197_v9, 16 }
 0x238   :  { %v312_v46 = vpop.xlane.xlu0 %311 }
 0x239   :  { %vm313_vm3 = vcmp.eq.f32.partialorder %v310_v19, %v312_v46  ;;  %v318_v19 = vcvt.f32.s32 %v312_v46 }
 0x23a   :  { %v314_v51 = vsel %vm313_vm3, %v309_v48, inf }
 0x23b   :  { %247 = vmin.xlane.f32.xlu1 %v246_v50  ;;  %315 = vmin.xlane.f32.xlu0 %v314_v51  ;;  %v319_v30 = vshll.u32 %v318_v19, 16 }
 0x23f   :  { %300 = vmin.xlane.f32.xlu1 %v299_v53 }
 0x2ad   :  { %v155_v57 = vpop.xlane.xlu0 %154 }
 0x2ae   :  { %v156_v59 = vcvt.f32.s32 %v155_v57 }
 0x2b0   :  { %v159_v0 = vadd.s32 %v158_v60, %v156_v59 }
 0x2b1   :  { %v140_v62 = vpop.xlane.xlu1 %139 }
 0x2b2   :  { %v141_v2 = vcvt.f32.s32 %v140_v62  ;;  %v168_v4 = vrot.slane %v159_v0, %v167_v61 }
 0x2b4   :  { %v144_v3 = vadd.s32 %v143_v63, %v141_v2 }
 0x2b6   :  { %v163_v5 = vrot.slane %v144_v3, %v162_v1 }
 0x2b8   :  { %v170_v6 = vsel %vm169_vm0, %v168_v4, %v163_v5 }
 0x2b9   :  { %172 = vst.msk [vmem:[#allocation2] sm:$0x1] %vm171_vm5, %v170_v6 }
 0x2bc   :  { %v210_v39 = vpop.xlane.xlu0 %209 }
 0x2bd   :  { %v211_v8 = vcvt.f32.s32 %v210_v39 }
 0x2bf   :  { %v214_v14 = vadd.s32 %v213_v10, %v211_v8 }
 0x2c0   :  { %v263_v11 = vpop.xlane.xlu0 %262 }
 0x2c1   :  { %v264_v16 = vcvt.f32.s32 %v263_v11  ;;  %v222_v23 = vrot.slane %v214_v14, %v167_v61 }
 0x2c3   :  { %v267_v26 = vadd.s32 %v266_v18, %v264_v16 }
 0x2c4   :  { %v195_v15 = vpop.xlane.xlu1 %194 }
 0x2c5   :  { %v196_v17 = vcvt.f32.s32 %v195_v15  ;;  %v275_v35 = vrot.slane %v267_v26, %v167_v61 }
 0x2c7   :  { %v199_v20 = vadd.s32 %v198_v40, %v196_v17 }
 0x2c8   :  { %v248_v24 = vpop.xlane.xlu1 %247  ;;  %v316_v25 = vpop.xlane.xlu0 %315 }
 0x2c9   :  { %v218_v27 = vrot.slane %v199_v20, %v162_v1  ;;  %v249_v28 = vcvt.f32.s32 %v248_v24  ;;  %v317_v29 = vcvt.f32.s32 %v316_v25 }
 0x2cb   :  { %v223_v31 = vsel %vm169_vm0, %v222_v23, %v218_v27  ;;  %v252_v32 = vadd.s32 %v251_v21, %v249_v28  ;;  %v320_v37 = vadd.s32 %v319_v30, %v317_v29 }
 0x2cc   :  { %v301_v34 = vpop.xlane.xlu1 %300  ;;  %224 = vst.msk [vmem:[#allocation2 + $0x1] sm:$0x1] %vm171_vm5, %v223_v31 }
 0x2cd   :  { %v271_v36 = vrot.slane %v252_v32, %v162_v1  ;;  %v302_v38 = vcvt.f32.s32 %v301_v34  ;;  %v328_v43 = vrot.slane %v320_v37, %v167_v61 }
 0x2cf   :  { %v276_v41 = vsel %vm169_vm0, %v275_v35, %v271_v36  ;;  %v305_v42 = vadd.s32 %v304_v33, %v302_v38 }
 0x2d0   :  { %277 = vst.msk [vmem:[#allocation2 + $0x2] sm:$0x1] %vm171_vm5, %v276_v41 }
 0x2d1   :  { %v324_v44 = vrot.slane %v305_v42, %v162_v1 }
 0x2d3   :  { %v329_v45 = vsel %vm169_vm0, %v328_v43, %v324_v44 }
 0x2d4   :  { %330 = vst.msk [vmem:[#allocation2 + $0x3] sm:$0x1] %vm171_vm5, %v329_v45 }
 0x2d5   :  { %446 = shalt.err (!%p443_p4)
}
 0x2d6   :  { %s447_s28 = scalar_lea.hbm %s618_s3, 64 }
 0x2d7   :  { %p448_p5 = scmp.ne.s32.totalorder %s618_s3, %s447_s28  ;;  %p451_p6 = scmp.lt.u32.totalorder %s447_s28, %s618_s3 }
 0x2d9   :  { %p453_p7 = pnand %p451_p6, %p448_p5 }
 0x2db   :  { %456 = shalt.err (!%p453_p7)
}
 0x2dc   :  { %340 = dma.vmem_to_hbm [thread:$0]  %s338_s24, 64, %s618_s3, [#allocation3]  }
 0x2dd   :  { %457 = dma.done.wait [#allocation3], 64  }
 0x2de   :  { %458 = vsyncadd [#allocation3], 4294967232 }
 0x2df   :  { %344 = vsyncpa [#allocation3], 1 }

</bundles_post_ra>
